<compile_context>
chip_gen: v5e
topology: v5e:2x2
jax: 0.10.0
libtpu: 0.0.40
codegen_flags: <defaults>
</compile_context>

<pallas_src>
import jax
import jax.numpy as jnp
from jax.experimental import pallas as pl
from jax.experimental.pallas import tpu as pltpu


def _prelu_kernel(alpha_ref, x_ref, o_ref):
    # alpha_ref: (1,) f32 scalar in SMEM; x_ref/o_ref: lane-dense VMEM tiles.
    alpha = alpha_ref[0]
    x = x_ref[...].astype(jnp.float32)
    o_ref[...] = jnp.maximum(x, alpha * x).astype(o_ref.dtype)


def _sublane_multiple(dtype):
    # Sub-32-bit dtypes pack along sublanes; keep block rows full-width packed.
    bits = jnp.dtype(dtype).itemsize * 8
    if bits >= 32:
        return 8
    if bits == 16:
        return 16
    return 32


def prelu(x, alpha, *, target_block_bytes=4 * 1024 * 1024):
    """Elementwise PReLU (scalar alpha) via a Pallas TPU kernel."""
    orig_shape = x.shape
    dtype = x.dtype
    total = x.size
    itemsize = jnp.dtype(dtype).itemsize
    sub = _sublane_multiple(dtype)

    # Pick the widest lane-dense last dim that divides the flat size, so the
    # common case needs no padding copy (no extra full-tensor HBM passes).
    lane = None
    for cand in (4096, 2048, 1024, 512, 256, 128):
        if total % cand == 0:
            lane = cand
            break

    if lane is None:
        # Rare fallback: flat size not a multiple of 128 -> pad once.
        lane = 128
        padded = pl.cdiv(total, lane) * lane
        x_flat = jnp.pad(jnp.ravel(x), (0, padded - total))
    else:
        padded = total
        x_flat = jnp.reshape(x, (padded,))

    rows = padded // lane
    x2d = x_flat.reshape(rows, lane)

    # MiB-scale blocks: ~target_block_bytes per block, rounded to the packed
    # sublane granularity. With 4 MiB blocks, in+out double-buffered is
    # ~16 MiB resident, safely under the 32 MiB vmem limit on all generations.
    block_rows = max(1, target_block_bytes // (lane * itemsize))
    if block_rows >= rows:
        block_rows = rows  # single full-extent block (small inputs)
    else:
        block_rows = max(sub, (block_rows // sub) * sub)
        block_rows = min(block_rows, rows)

    alpha_arr = jnp.asarray([alpha], dtype=jnp.float32)
    grid = (pl.cdiv(rows, block_rows),)

    out2d = pl.pallas_call(
        _prelu_kernel,
        out_shape=jax.ShapeDtypeStruct((rows, lane), dtype),
        grid=grid,
        in_specs=[
            pl.BlockSpec(memory_space=pltpu.SMEM),              # alpha scalar
            pl.BlockSpec((block_rows, lane), lambda i: (i, 0)),  # x tile
        ],
        out_specs=pl.BlockSpec((block_rows, lane), lambda i: (i, 0)),
        compiler_params=pltpu.CompilerParams(
            dimension_semantics=("parallel",),
            vmem_limit_bytes=32 << 20,
        ),
    )(alpha_arr, x2d)

    if padded != total:
        return out2d.reshape(-1)[:total].reshape(orig_shape)
    return out2d.reshape(orig_shape)


# TODO(synk): per-channel alpha (PyTorch num_parameters=C) would need a
# channel-aware tiling (C on the lane axis); scalar-alpha module needs none.


if __name__ == "__main__":
    key = jax.random.PRNGKey(0)

    # NCHW input matching the module: batch=2, channels=4, spatial=16x16.
    x = jax.random.normal(key, (2, 4, 16, 16), dtype=jnp.float32)
    alpha = 0.25  # non-trivial value so the negative branch is exercised

    y = prelu(x, alpha)
    y = jax.block_until_ready(y)

    y_ref = jnp.maximum(x, alpha * x)
    assert y.shape == x.shape and y.dtype == x.dtype
    assert jnp.allclose(y, y_ref, atol=1e-6, rtol=1e-6)

    # Also exercise the non-128-divisible (padding) fallback path once.
    x_odd = jax.random.normal(jax.random.PRNGKey(1), (3, 5, 7, 11),
                              dtype=jnp.float32)
    y_odd = jax.block_until_ready(prelu(x_odd, alpha))
    assert jnp.allclose(y_odd, jnp.maximum(x_odd, alpha * x_odd),
                        atol=1e-6, rtol=1e-6)

    print("KERNEL_OK")
</pallas_src>

<mosaic_0001>
module attributes {stable_mosaic.version = 11 : i64} {
  func.func @_prelu_kernel(%arg0: i32, %arg1: memref<1xf32, #tpu.memory_space<smem>>, %arg2: memref<1x2048xf32, #tpu.memory_space<vmem>>, %arg3: memref<1x2048xf32, #tpu.memory_space<vmem>>) attributes {dimension_semantics = [#tpu.dimension_semantics<parallel>], iteration_bounds = array<i64: 1>, scalar_prefetch = 0 : i64, scratch_operands = 0 : i64, tpu.core_type = #tpu.core_type<tc>, window_params = [{transform_indices = @transform_0, window_bounds = array<i64: 1>}, {transform_indices = @transform_1, window_bounds = array<i64: 1, 2048>}, {transform_indices = @transform_2, window_bounds = array<i64: 1, 2048>}]} {
    %c0 = arith.constant 0 : index
    %0 = memref.load %arg1[%c0] : memref<1xf32, #tpu.memory_space<smem>>
    %c0_0 = arith.constant 0 : index
    %c0_1 = arith.constant 0 : index
    %1 = vector.load %arg2[%c0_0, %c0_1] : memref<1x2048xf32, #tpu.memory_space<vmem>>, vector<1x2048xf32>
    %2 = vector.broadcast %0 : f32 to vector<1x2048xf32>
    %3 = arith.mulf %2, %1 : vector<1x2048xf32>
    %4 = arith.maximumf %1, %3 : vector<1x2048xf32>
    %c0_2 = arith.constant 0 : index
    %c0_3 = arith.constant 0 : index
    %5 = vector.load %arg3[%c0_2, %c0_3] : memref<1x2048xf32, #tpu.memory_space<vmem>>, vector<1x2048xf32>
    tpu.vector_store %arg3[%c0_2, %c0_3], %4 {strides = array<i32>} : memref<1x2048xf32, #tpu.memory_space<vmem>>, vector<1x2048xf32>,
    return
  }
  func.func @transform_0(%arg0: i32) -> i32 {
    %c0_i32 = arith.constant 0 : i32
    %c0_i32_0 = arith.constant 0 : i32
    return %c0_i32 : i32
  }
  func.func @transform_1(%arg0: i32) -> (i32, i32) {
    %c0_i32 = arith.constant 0 : i32
    %c0_i32_0 = arith.constant 0 : i32
    return %arg0, %c0_i32 : i32, i32
  }
  func.func @transform_2(%arg0: i32) -> (i32, i32) {
    %c0_i32 = arith.constant 0 : i32
    %c0_i32_0 = arith.constant 0 : i32
    return %arg0, %c0_i32 : i32, i32
  }
}

</mosaic_0001>

<bundles_post_ra>
// kernel: tpu_custom_call.1
= control target key start
LH: loop header
LB: loop body
LE: loop exit
PB: predicated region body
PF: predicated region fallthrough
CT: control target
= control target key end

     0   :  { %8 = vsyncpa [#allocation4], 0  ;;  %s134_s0 = inlined_call_operand.<no memory space> [shape: f32[1], index: 0, kind: input, shape index: {}]   ;;  %s135_s1 = inlined_call_operand.hbm [shape: f32[1,2048], index: 1, kind: input, shape index: {}]   ;;  %s136_s2 = inlined_call_operand.hbm [shape: f32[1,2048], index: 2, kind: output, shape index: {}]  }
   0x1   :  { %9 = vsyncpa [#allocation5], 0  ;;  %s17_s11 = sshll.u32 %s135_s1, 4  ;;  %s108_s12 = smov [#allocation3]   ;;  %s18_s11 = int_to_ptr.hbm [resolvable:$true] %s17_s11 }
   0x2   :  { %s19_s13 = sshll.u32 %s108_s12, 4  ;;  %s20_s13 = int_to_ptr.vmem [resolvable:$true] %s19_s13 }
   0x3   :  { %22 = dma.hbm_to_vmem [thread:$0]  %s18_s11, 256, %s20_s13, [#allocation4]  }
   0x4   :  { %104 = dma.done.wait [#allocation4], 256  }
   0x5   :  { %105 = vsyncadd [#allocation4], 4294967040  ;;  %v30_v0 = vstv %s134_s0  ;;  %v28_v1 = vld [vmem:[#allocation3] sm:$0xff]  ;;  %v29_v2 = vld [vmem:[#allocation3 + $0x8] sm:$0xff]  ;;  %s109_s16 = smov [#allocation6]   ;;  %s44_s1 = sshll.u32 %s136_s2, 4  ;;  %s45_s1 = int_to_ptr.hbm [resolvable:$true] %s44_s1 }
   0x6   :  { %v31_v3 = vmul.f32 %v30_v0, %v28_v1  ;;  %v32_v4 = vmul.f32 %v30_v0, %v29_v2  ;;  %s42_s17 = sshll.u32 %s109_s16, 4  ;;  %s43_s17 = int_to_ptr.vmem [resolvable:$true] %s42_s17 }
   0x8   :  { %v33_v5 = vmax.f32 %v28_v1, %v31_v3  ;;  %v34_v6 = vmax.f32 %v29_v2, %v32_v4 }
   0xa   :  { %35 = vst [vmem:[#allocation6] sm:$0xff] %v33_v5 }
   0xb   :  { %36 = vst [vmem:[#allocation6 + $0x8] sm:$0xff] %v34_v6 }
   0xc   :  { %47 = dma.vmem_to_hbm [thread:$0]  %s43_s17, 256, %s45_s1, [#allocation5]  }
   0xd   :  { %106 = dma.done.wait [#allocation5], 256  }
   0xe   :  { %107 = vsyncadd [#allocation5], 4294967040 }
   0xf   :  { %52 = vsyncpa [#allocation4], 1 }
  0x10   :  { %53 = vsyncpa [#allocation5], 1 }

</bundles_post_ra>
